<compile_context>
chip_gen: v6e
topology: v6e:2x2x1
jax: 0.10.0
libtpu: 0.0.40
codegen_flags: <defaults>
</compile_context>

<pallas_src>
import jax
import jax.numpy as jnp
from jax import lax
from jax.experimental import pallas as pl
from jax.experimental.pallas import tpu as pltpu

KT = 25        # temporal conv kernel width   (fixed by the module)
POOL_W = 75    # avg-pool window              (fixed by the module)
POOL_S = 15    # avg-pool stride              (fixed by the module)


def _elu(h):
    # ELU(alpha=1): x if x > 0 else exp(x) - 1   (exp rides the EUP slot)
    return jnp.where(h > 0, h, jnp.exp(h) - 1.0)


def shallow_convnet_kernel(x_ref, l_ref, bt_ref, ws_ref, bs_ref,
                           pool_ref, wd_ref, bd_ref, out_ref, r_ref):
    """One grid step == one block of TB batch elements.

    Layouts (lanes carry the wide (b, t) axis):
      x_ref[0]  (C_pad,     TB*T)       rows = channel,   cols = (b, t)
      r_ref     (KT*C_pad,  W)          rows = (k, c),    cols = (b, t)   im2col
      ht        (F_t*C,     W)          rows = (f, c),    cols = (b, t)
      hs        (F_s,       W)          rows = s,         cols = (b, t)
      pooled    (F_s,       n_pool*TB)  rows = s,         cols = (p, b)
      out       (n_classes, TB)         rows = class,     cols = b
    W = TB*T - KT + 1.
    """
    c_pad = x_ref.shape[1]
    w = pool_ref.shape[0]                            # W = TB*T - KT + 1

    # --- im2col into VMEM scratch, built once per batch block:
    #     R[k*C_pad + c, j] = x[c, j + k]   (dst rows are sublane-aligned) ---
    for k in range(KT):                              # KT is small and static
        r_ref[k * c_pad:(k + 1) * c_pad, :] = x_ref[0, :, k:k + w]

    # --- temporal convolution (1, KT) as one MXU matmul, output already in
    #     the (F_t*C, lanes) layout the spatial conv consumes ---
    ht = jnp.dot(l_ref[...], r_ref[...], preferred_element_type=jnp.float32)
    ht = _elu(ht + bt_ref[...])                      # bias per temporal filter

    # --- spatial convolution (C, 1): ws(F_s, F_t*C) @ elu(ht) ---
    hs = jnp.dot(ws_ref[...], ht, preferred_element_type=jnp.float32)
    hs = _elu(hs + bs_ref[...])
    hs = hs * hs                                     # h ** 2

    # --- average pool (1,75)/15 as a matmul against a banded pooling matrix ---
    pooled = jnp.dot(hs, pool_ref[...],
                     preferred_element_type=jnp.float32)   # (F_s, n_pool*TB)
    logp = jnp.log(pooled)

    # --- dense: out[n, b] = sum_{s,p} wd[n, s*n_pool+p] * logp[s, (p, b)] ---
    n_pool, n_classes, _ = wd_ref.shape
    tb = out_ref.shape[2]
    acc = jnp.zeros((n_classes, tb), jnp.float32)
    for p in range(n_pool):                          # n_pool is small and static
        acc = acc + jnp.dot(wd_ref[p], logp[:, p * tb:(p + 1) * tb],
                            preferred_element_type=jnp.float32)
    out_ref[0] = (acc + bd_ref[...]).astype(out_ref.dtype)


def shallow_convnet_forward(x, params, *, batch_block=None):
    """x: (B, C, T) float32 (the PyTorch (B,1,C,T) view squeezed).
    params in PyTorch layouts.  Returns (B, n_classes)."""
    wt, bt, ws, bs, wd, bd = params
    B, C, T = x.shape
    f_t = wt.shape[0]
    f_s = ws.shape[0]
    t_out = T - KT + 1
    n_pool = (t_out - POOL_W) // POOL_S + 1
    n_classes = bd.shape[-1]

    tb = min(B, batch_block or 8)      # batch block per grid step (tune per chip)
    nb = -(-B // tb)                   # number of grid steps
    b_pad = nb * tb
    c_pad = -(-C // 8) * 8             # sublane-align the channel axis
    tbt = tb * T
    w_blk = tbt - KT + 1

    # ------------- layout plumbing + weight repacking (plain JAX) -------------
    xp = x
    if b_pad != B:
        xp = jnp.concatenate([xp, jnp.zeros((b_pad - B, C, T), x.dtype)], axis=0)
    if c_pad != C:
        xp = jnp.concatenate([xp, jnp.zeros((b_pad, c_pad - C, T), x.dtype)], axis=1)
    # (nb, C_pad, TB*T): rows = channel, cols = (within-block batch, time)
    x_in = xp.reshape(nb, tb, c_pad, T).transpose(0, 2, 1, 3).reshape(nb, c_pad, tbt)

    wt2 = wt.reshape(f_t, KT)                        # from (F_t, 1, 1, KT)
    # L[(f, c), (k, c')] = wt[f, k] * delta(c, c')  -> temporal conv as a matmul
    l_big = (wt2[:, None, :, None] *
             jnp.eye(C, c_pad, dtype=wt2.dtype)[None, :, None, :]
             ).reshape(f_t * C, KT * c_pad)
    bt_big = jnp.repeat(bt, C).reshape(f_t * C, 1)   # bias replicated per channel
    ws_flat = ws.reshape(f_s, f_t * C)               # from (F_s, F_t, C, 1)
    bs2 = bs.reshape(f_s, 1)

    # Banded per-element pooling matrix (T, n_pool), block-diagonal over the TB
    # elements of a block, columns ordered (p, b), rows truncated to W.
    t_idx = jnp.arange(T)[:, None]
    p_idx = jnp.arange(n_pool)[None, :]
    p_one = ((t_idx >= p_idx * POOL_S) &
             (t_idx < p_idx * POOL_S + POOL_W)).astype(jnp.float32) / POOL_W
    pool_mat = jnp.kron(jnp.eye(tb, dtype=jnp.float32), p_one)       # cols (b, p)
    pool_mat = (pool_mat.reshape(tbt, tb, n_pool)
                .transpose(0, 2, 1).reshape(tbt, n_pool * tb))[:w_blk]  # cols (p, b)

    wd_re = wd.reshape(n_classes, f_s, n_pool).transpose(2, 0, 1)    # (n_pool, nc, F_s)
    bd2 = bd.reshape(n_classes, 1)

    out = pl.pallas_call(
        shallow_convnet_kernel,
        out_shape=jax.ShapeDtypeStruct((nb, n_classes, tb), jnp.float32),
        grid=(nb,),
        in_specs=[
            pl.BlockSpec((1, c_pad, tbt), lambda bb: (bb, 0, 0)),         # x block
            pl.BlockSpec((f_t * C, KT * c_pad), lambda bb: (0, 0)),       # L_big
            pl.BlockSpec((f_t * C, 1), lambda bb: (0, 0)),                # bt
            pl.BlockSpec((f_s, f_t * C), lambda bb: (0, 0)),              # ws
            pl.BlockSpec((f_s, 1), lambda bb: (0, 0)),                    # bs
            pl.BlockSpec((w_blk, n_pool * tb), lambda bb: (0, 0)),        # pool mat
            pl.BlockSpec((n_pool, n_classes, f_s), lambda bb: (0, 0, 0)),  # wd
            pl.BlockSpec((n_classes, 1), lambda bb: (0, 0)),              # bd
        ],
        out_specs=pl.BlockSpec((1, n_classes, tb), lambda bb: (bb, 0, 0)),
        scratch_shapes=[pltpu.VMEM((KT * c_pad, w_blk), jnp.float32)],    # im2col R
        compiler_params=pltpu.CompilerParams(
            dimension_semantics=("parallel",)),      # batch blocks shard across TCs
    )(x_in, l_big, bt_big, ws_flat, bs2, pool_mat, wd_re, bd2)

    out = out.transpose(0, 2, 1).reshape(b_pad, n_classes)
    return out[:B]


def reference_forward(x, params):
    """Pure-JAX reference mirroring the PyTorch forward exactly."""
    wt, bt, ws, bs, wd, bd = params
    B, C, T = x.shape
    h = x.reshape(B, 1, C, T)
    h = lax.conv_general_dilated(h, wt, (1, 1), 'VALID',
                                 dimension_numbers=('NCHW', 'OIHW', 'NCHW'))
    h = h + bt.reshape(1, -1, 1, 1)
    h = jnp.where(h > 0, h, jnp.exp(h) - 1.0)
    h = lax.conv_general_dilated(h, ws, (1, 1), 'VALID',
                                 dimension_numbers=('NCHW', 'OIHW', 'NCHW'))
    h = h + bs.reshape(1, -1, 1, 1)
    h = jnp.where(h > 0, h, jnp.exp(h) - 1.0)
    h = h ** 2
    h = lax.reduce_window(h, 0.0, lax.add,
                          (1, 1, 1, POOL_W), (1, 1, 1, POOL_S), 'VALID') / POOL_W
    h = jnp.log(h)
    h = h.reshape(B, -1)
    return h @ wd.T + bd


if __name__ == "__main__":
    # Small shapes consistent with the fixed (1,25) conv and (1,75)/15 pool:
    # C=4 electrodes, T=114 samples -> t_out=90 -> n_pool=2 -> dense in = F_s*2.
    # B=4 with batch_block=2 exercises a 2-step parallel grid.
    B, C, T = 4, 4, 114
    F_T, F_S, N_CLASSES = 8, 8, 4
    t_out = T - KT + 1
    n_pool = (t_out - POOL_W) // POOL_S + 1

    key = jax.random.PRNGKey(0)
    kx, k1, k2, k3, k4, k5, k6 = jax.random.split(key, 7)
    x = jax.random.normal(kx, (B, C, T), jnp.float32)
    # deterministic synthetic parameters in PyTorch layouts
    wt = 0.1 * jax.random.normal(k1, (F_T, 1, 1, KT), jnp.float32)      # Conv2d(1, F_t, (1,25))
    bt = 0.1 * jax.random.normal(k2, (F_T,), jnp.float32)
    ws = 0.1 * jax.random.normal(k3, (F_S, F_T, C, 1), jnp.float32)     # Conv2d(F_t, F_s, (C,1))
    bs = 0.1 * jax.random.normal(k4, (F_S,), jnp.float32)
    wd = 0.1 * jax.random.normal(k5, (N_CLASSES, F_S * n_pool), jnp.float32)  # Linear
    bd = 0.1 * jax.random.normal(k6, (N_CLASSES,), jnp.float32)
    params = (wt, bt, ws, bs, wd, bd)

    out = jax.block_until_ready(shallow_convnet_forward(x, params, batch_block=2))
    ref = jax.block_until_ready(reference_forward(x, params))
    assert out.shape == (B, N_CLASSES)
    assert jnp.allclose(out, ref, rtol=5e-3, atol=5e-3), (out, ref)
    print("KERNEL_OK")
</pallas_src>

<mosaic_0001>
module attributes {stable_mosaic.version = 11 : i64} {
  func.func @shallow_convnet_kernel(%arg0: i32, %arg1: memref<1x8x228xf32, #tpu.memory_space<vmem>>, %arg2: memref<32x200xf32, #tpu.memory_space<vmem>>, %arg3: memref<32x1xf32, #tpu.memory_space<vmem>>, %arg4: memref<8x32xf32, #tpu.memory_space<vmem>>, %arg5: memref<8x1xf32, #tpu.memory_space<vmem>>, %arg6: memref<204x4xf32, #tpu.memory_space<vmem>>, %arg7: memref<2x4x8xf32, #tpu.memory_space<vmem>>, %arg8: memref<4x1xf32, #tpu.memory_space<vmem>>, %arg9: memref<1x4x2xf32, #tpu.memory_space<vmem>>, %arg10: memref<200x204xf32, #tpu.memory_space<vmem>>) attributes {dimension_semantics = [#tpu.dimension_semantics<parallel>], iteration_bounds = array<i64: 2>, scalar_prefetch = 0 : i64, scratch_operands = 1 : i64, tpu.core_type = #tpu.core_type<tc>, window_params = [{transform_indices = @transform_0, window_bounds = array<i64: 1, 8, 228>}, {pipeline_mode = #tpu.pipeline_mode<synchronous>, transform_indices = @transform_1, window_bounds = array<i64: 32, 200>}, {pipeline_mode = #tpu.pipeline_mode<synchronous>, transform_indices = @transform_2, window_bounds = array<i64: 32, 1>}, {pipeline_mode = #tpu.pipeline_mode<synchronous>, transform_indices = @transform_3, window_bounds = array<i64: 8, 32>}, {pipeline_mode = #tpu.pipeline_mode<synchronous>, transform_indices = @transform_4, window_bounds = array<i64: 8, 1>}, {pipeline_mode = #tpu.pipeline_mode<synchronous>, transform_indices = @transform_5, window_bounds = array<i64: 204, 4>}, {pipeline_mode = #tpu.pipeline_mode<synchronous>, transform_indices = @transform_6, window_bounds = array<i64: 2, 4, 8>}, {pipeline_mode = #tpu.pipeline_mode<synchronous>, transform_indices = @transform_7, window_bounds = array<i64: 4, 1>}, {transform_indices = @transform_8, window_bounds = array<i64: 1, 4, 2>}]} {
    %c0 = arith.constant 0 : index
    %c0_0 = arith.constant 0 : index
    %c0_1 = arith.constant 0 : index
    %0 = vector.load %arg1[%c0, %c0_0, %c0_1] : memref<1x8x228xf32, #tpu.memory_space<vmem>>, vector<1x8x204xf32>
    %1 = vector.shape_cast %0 : vector<1x8x204xf32> to vector<8x204xf32>
    %c0_2 = arith.constant 0 : index
    %c0_3 = arith.constant 0 : index
    %2 = vector.load %arg10[%c0_2, %c0_3] : memref<200x204xf32, #tpu.memory_space<vmem>>, vector<8x204xf32>
    tpu.vector_store %arg10[%c0_2, %c0_3], %1 {strides = array<i32>} : memref<200x204xf32, #tpu.memory_space<vmem>>, vector<8x204xf32>,
    %c0_4 = arith.constant 0 : index
    %c0_5 = arith.constant 0 : index
    %c1 = arith.constant 1 : index
    %3 = vector.load %arg1[%c0_4, %c0_5, %c1] : memref<1x8x228xf32, #tpu.memory_space<vmem>>, vector<1x8x204xf32>
    %4 = vector.shape_cast %3 : vector<1x8x204xf32> to vector<8x204xf32>
    %c8 = arith.constant 8 : index
    %c0_6 = arith.constant 0 : index
    %5 = vector.load %arg10[%c8, %c0_6] : memref<200x204xf32, #tpu.memory_space<vmem>>, vector<8x204xf32>
    tpu.vector_store %arg10[%c8, %c0_6], %4 {strides = array<i32>} : memref<200x204xf32, #tpu.memory_space<vmem>>, vector<8x204xf32>,
    %c0_7 = arith.constant 0 : index
    %c0_8 = arith.constant 0 : index
    %c2 = arith.constant 2 : index
    %6 = vector.load %arg1[%c0_7, %c0_8, %c2] : memref<1x8x228xf32, #tpu.memory_space<vmem>>, vector<1x8x204xf32>
    %7 = vector.shape_cast %6 : vector<1x8x204xf32> to vector<8x204xf32>
    %c16 = arith.constant 16 : index
    %c0_9 = arith.constant 0 : index
    %8 = vector.load %arg10[%c16, %c0_9] : memref<200x204xf32, #tpu.memory_space<vmem>>, vector<8x204xf32>
    tpu.vector_store %arg10[%c16, %c0_9], %7 {strides = array<i32>} : memref<200x204xf32, #tpu.memory_space<vmem>>, vector<8x204xf32>,
    %c0_10 = arith.constant 0 : index
    %c0_11 = arith.constant 0 : index
    %c3 = arith.constant 3 : index
    %9 = vector.load %arg1[%c0_10, %c0_11, %c3] : memref<1x8x228xf32, #tpu.memory_space<vmem>>, vector<1x8x204xf32>
    %10 = vector.shape_cast %9 : vector<1x8x204xf32> to vector<8x204xf32>
    %c24 = arith.constant 24 : index
    %c0_12 = arith.constant 0 : index
    %11 = vector.load %arg10[%c24, %c0_12] : memref<200x204xf32, #tpu.memory_space<vmem>>, vector<8x204xf32>
    tpu.vector_store %arg10[%c24, %c0_12], %10 {strides = array<i32>} : memref<200x204xf32, #tpu.memory_space<vmem>>, vector<8x204xf32>,
    %c0_13 = arith.constant 0 : index
    %c0_14 = arith.constant 0 : index
    %c4 = arith.constant 4 : index
    %12 = vector.load %arg1[%c0_13, %c0_14, %c4] : memref<1x8x228xf32, #tpu.memory_space<vmem>>, vector<1x8x204xf32>
    %13 = vector.shape_cast %12 : vector<1x8x204xf32> to vector<8x204xf32>
    %c32 = arith.constant 32 : index
    %c0_15 = arith.constant 0 : index
    %14 = vector.load %arg10[%c32, %c0_15] : memref<200x204xf32, #tpu.memory_space<vmem>>, vector<8x204xf32>
    tpu.vector_store %arg10[%c32, %c0_15], %13 {strides = array<i32>} : memref<200x204xf32, #tpu.memory_space<vmem>>, vector<8x204xf32>,
    %c0_16 = arith.constant 0 : index
    %c0_17 = arith.constant 0 : index
    %c5 = arith.constant 5 : index
    %15 = vector.load %arg1[%c0_16, %c0_17, %c5] : memref<1x8x228xf32, #tpu.memory_space<vmem>>, vector<1x8x204xf32>
    %16 = vector.shape_cast %15 : vector<1x8x204xf32> to vector<8x204xf32>
    %c40 = arith.constant 40 : index
    %c0_18 = arith.constant 0 : index
    %17 = vector.load %arg10[%c40, %c0_18] : memref<200x204xf32, #tpu.memory_space<vmem>>, vector<8x204xf32>
    tpu.vector_store %arg10[%c40, %c0_18], %16 {strides = array<i32>} : memref<200x204xf32, #tpu.memory_space<vmem>>, vector<8x204xf32>,
    %c0_19 = arith.constant 0 : index
    %c0_20 = arith.constant 0 : index
    %c6 = arith.constant 6 : index
    %18 = vector.load %arg1[%c0_19, %c0_20, %c6] : memref<1x8x228xf32, #tpu.memory_space<vmem>>, vector<1x8x204xf32>
    %19 = vector.shape_cast %18 : vector<1x8x204xf32> to vector<8x204xf32>
    %c48 = arith.constant 48 : index
    %c0_21 = arith.constant 0 : index
    %20 = vector.load %arg10[%c48, %c0_21] : memref<200x204xf32, #tpu.memory_space<vmem>>, vector<8x204xf32>
    tpu.vector_store %arg10[%c48, %c0_21], %19 {strides = array<i32>} : memref<200x204xf32, #tpu.memory_space<vmem>>, vector<8x204xf32>,
    %c0_22 = arith.constant 0 : index
    %c0_23 = arith.constant 0 : index
    %c7 = arith.constant 7 : index
    %21 = vector.load %arg1[%c0_22, %c0_23, %c7] : memref<1x8x228xf32, #tpu.memory_space<vmem>>, vector<1x8x204xf32>
    %22 = vector.shape_cast %21 : vector<1x8x204xf32> to vector<8x204xf32>
    %c56 = arith.constant 56 : index
    %c0_24 = arith.constant 0 : index
    %23 = vector.load %arg10[%c56, %c0_24] : memref<200x204xf32, #tpu.memory_space<vmem>>, vector<8x204xf32>
    tpu.vector_store %arg10[%c56, %c0_24], %22 {strides = array<i32>} : memref<200x204xf32, #tpu.memory_space<vmem>>, vector<8x204xf32>,
    %c0_25 = arith.constant 0 : index
    %c0_26 = arith.constant 0 : index
    %c8_27 = arith.constant 8 : index
    %24 = vector.load %arg1[%c0_25, %c0_26, %c8_27] : memref<1x8x228xf32, #tpu.memory_space<vmem>>, vector<1x8x204xf32>
    %25 = vector.shape_cast %24 : vector<1x8x204xf32> to vector<8x204xf32>
    %c64 = arith.constant 64 : index
    %c0_28 = arith.constant 0 : index
    %26 = vector.load %arg10[%c64, %c0_28] : memref<200x204xf32, #tpu.memory_space<vmem>>, vector<8x204xf32>
    tpu.vector_store %arg10[%c64, %c0_28], %25 {strides = array<i32>} : memref<200x204xf32, #tpu.memory_space<vmem>>, vector<8x204xf32>,
    %c0_29 = arith.constant 0 : index
    %c0_30 = arith.constant 0 : index
    %c9 = arith.constant 9 : index
    %27 = vector.load %arg1[%c0_29, %c0_30, %c9] : memref<1x8x228xf32, #tpu.memory_space<vmem>>, vector<1x8x204xf32>
    %28 = vector.shape_cast %27 : vector<1x8x204xf32> to vector<8x204xf32>
    %c72 = arith.constant 72 : index
    %c0_31 = arith.constant 0 : index
    %29 = vector.load %arg10[%c72, %c0_31] : memref<200x204xf32, #tpu.memory_space<vmem>>, vector<8x204xf32>
    tpu.vector_store %arg10[%c72, %c0_31], %28 {strides = array<i32>} : memref<200x204xf32, #tpu.memory_space<vmem>>, vector<8x204xf32>,
    %c0_32 = arith.constant 0 : index
    %c0_33 = arith.constant 0 : index
    %c10 = arith.constant 10 : index
    %30 = vector.load %arg1[%c0_32, %c0_33, %c10] : memref<1x8x228xf32, #tpu.memory_space<vmem>>, vector<1x8x204xf32>
    %31 = vector.shape_cast %30 : vector<1x8x204xf32> to vector<8x204xf32>
    %c80 = arith.constant 80 : index
    %c0_34 = arith.constant 0 : index
    %32 = vector.load %arg10[%c80, %c0_34] : memref<200x204xf32, #tpu.memory_space<vmem>>, vector<8x204xf32>
    tpu.vector_store %arg10[%c80, %c0_34], %31 {strides = array<i32>} : memref<200x204xf32, #tpu.memory_space<vmem>>, vector<8x204xf32>,
    %c0_35 = arith.constant 0 : index
    %c0_36 = arith.constant 0 : index
    %c11 = arith.constant 11 : index
    %33 = vector.load %arg1[%c0_35, %c0_36, %c11] : memref<1x8x228xf32, #tpu.memory_space<vmem>>, vector<1x8x204xf32>
    %34 = vector.shape_cast %33 : vector<1x8x204xf32> to vector<8x204xf32>
    %c88 = arith.constant 88 : index
    %c0_37 = arith.constant 0 : index
    %35 = vector.load %arg10[%c88, %c0_37] : memref<200x204xf32, #tpu.memory_space<vmem>>, vector<8x204xf32>
    tpu.vector_store %arg10[%c88, %c0_37], %34 {strides = array<i32>} : memref<200x204xf32, #tpu.memory_space<vmem>>, vector<8x204xf32>,
    %c0_38 = arith.constant 0 : index
    %c0_39 = arith.constant 0 : index
    %c12 = arith.constant 12 : index
    %36 = vector.load %arg1[%c0_38, %c0_39, %c12] : memref<1x8x228xf32, #tpu.memory_space<vmem>>, vector<1x8x204xf32>
    %37 = vector.shape_cast %36 : vector<1x8x204xf32> to vector<8x204xf32>
    %c96 = arith.constant 96 : index
    %c0_40 = arith.constant 0 : index
    %38 = vector.load %arg10[%c96, %c0_40] : memref<200x204xf32, #tpu.memory_space<vmem>>, vector<8x204xf32>
    tpu.vector_store %arg10[%c96, %c0_40], %37 {strides = array<i32>} : memref<200x204xf32, #tpu.memory_space<vmem>>, vector<8x204xf32>,
    %c0_41 = arith.constant 0 : index
    %c0_42 = arith.constant 0 : index
    %c13 = arith.constant 13 : index
    %39 = vector.load %arg1[%c0_41, %c0_42, %c13] : memref<1x8x228xf32, #tpu.memory_space<vmem>>, vector<1x8x204xf32>
    %40 = vector.shape_cast %39 : vector<1x8x204xf32> to vector<8x204xf32>
    %c104 = arith.constant 104 : index
    %c0_43 = arith.constant 0 : index
    %41 = vector.load %arg10[%c104, %c0_43] : memref<200x204xf32, #tpu.memory_space<vmem>>, vector<8x204xf32>
    tpu.vector_store %arg10[%c104, %c0_43], %40 {strides = array<i32>} : memref<200x204xf32, #tpu.memory_space<vmem>>, vector<8x204xf32>,
    %c0_44 = arith.constant 0 : index
    %c0_45 = arith.constant 0 : index
    %c14 = arith.constant 14 : index
    %42 = vector.load %arg1[%c0_44, %c0_45, %c14] : memref<1x8x228xf32, #tpu.memory_space<vmem>>, vector<1x8x204xf32>
    %43 = vector.shape_cast %42 : vector<1x8x204xf32> to vector<8x204xf32>
    %c112 = arith.constant 112 : index
    %c0_46 = arith.constant 0 : index
    %44 = vector.load %arg10[%c112, %c0_46] : memref<200x204xf32, #tpu.memory_space<vmem>>, vector<8x204xf32>
    tpu.vector_store %arg10[%c112, %c0_46], %43 {strides = array<i32>} : memref<200x204xf32, #tpu.memory_space<vmem>>, vector<8x204xf32>,
    %c0_47 = arith.constant 0 : index
    %c0_48 = arith.constant 0 : index
    %c15 = arith.constant 15 : index
    %45 = vector.load %arg1[%c0_47, %c0_48, %c15] : memref<1x8x228xf32, #tpu.memory_space<vmem>>, vector<1x8x204xf32>
    %46 = vector.shape_cast %45 : vector<1x8x204xf32> to vector<8x204xf32>
    %c120 = arith.constant 120 : index
    %c0_49 = arith.constant 0 : index
    %47 = vector.load %arg10[%c120, %c0_49] : memref<200x204xf32, #tpu.memory_space<vmem>>, vector<8x204xf32>
    tpu.vector_store %arg10[%c120, %c0_49], %46 {strides = array<i32>} : memref<200x204xf32, #tpu.memory_space<vmem>>, vector<8x204xf32>,
    %c0_50 = arith.constant 0 : index
    %c0_51 = arith.constant 0 : index
    %c16_52 = arith.constant 16 : index
    %48 = vector.load %arg1[%c0_50, %c0_51, %c16_52] : memref<1x8x228xf32, #tpu.memory_space<vmem>>, vector<1x8x204xf32>
    %49 = vector.shape_cast %48 : vector<1x8x204xf32> to vector<8x204xf32>
    %c128 = arith.constant 128 : index
    %c0_53 = arith.constant 0 : index
    %50 = vector.load %arg10[%c128, %c0_53] : memref<200x204xf32, #tpu.memory_space<vmem>>, vector<8x204xf32>
    tpu.vector_store %arg10[%c128, %c0_53], %49 {strides = array<i32>} : memref<200x204xf32, #tpu.memory_space<vmem>>, vector<8x204xf32>,
    %c0_54 = arith.constant 0 : index
    %c0_55 = arith.constant 0 : index
    %c17 = arith.constant 17 : index
    %51 = vector.load %arg1[%c0_54, %c0_55, %c17] : memref<1x8x228xf32, #tpu.memory_space<vmem>>, vector<1x8x204xf32>
    %52 = vector.shape_cast %51 : vector<1x8x204xf32> to vector<8x204xf32>
    %c136 = arith.constant 136 : index
    %c0_56 = arith.constant 0 : index
    %53 = vector.load %arg10[%c136, %c0_56] : memref<200x204xf32, #tpu.memory_space<vmem>>, vector<8x204xf32>
    tpu.vector_store %arg10[%c136, %c0_56], %52 {strides = array<i32>} : memref<200x204xf32, #tpu.memory_space<vmem>>, vector<8x204xf32>,
    %c0_57 = arith.constant 0 : index
    %c0_58 = arith.constant 0 : index
    %c18 = arith.constant 18 : index
    %54 = vector.load %arg1[%c0_57, %c0_58, %c18] : memref<1x8x228xf32, #tpu.memory_space<vmem>>, vector<1x8x204xf32>
    %55 = vector.shape_cast %54 : vector<1x8x204xf32> to vector<8x204xf32>
    %c144 = arith.constant 144 : index
    %c0_59 = arith.constant 0 : index
    %56 = vector.load %arg10[%c144, %c0_59] : memref<200x204xf32, #tpu.memory_space<vmem>>, vector<8x204xf32>
    tpu.vector_store %arg10[%c144, %c0_59], %55 {strides = array<i32>} : memref<200x204xf32, #tpu.memory_space<vmem>>, vector<8x204xf32>,
    %c0_60 = arith.constant 0 : index
    %c0_61 = arith.constant 0 : index
    %c19 = arith.constant 19 : index
    %57 = vector.load %arg1[%c0_60, %c0_61, %c19] : memref<1x8x228xf32, #tpu.memory_space<vmem>>, vector<1x8x204xf32>
    %58 = vector.shape_cast %57 : vector<1x8x204xf32> to vector<8x204xf32>
    %c152 = arith.constant 152 : index
    %c0_62 = arith.constant 0 : index
    %59 = vector.load %arg10[%c152, %c0_62] : memref<200x204xf32, #tpu.memory_space<vmem>>, vector<8x204xf32>
    tpu.vector_store %arg10[%c152, %c0_62], %58 {strides = array<i32>} : memref<200x204xf32, #tpu.memory_space<vmem>>, vector<8x204xf32>,
    %c0_63 = arith.constant 0 : index
    %c0_64 = arith.constant 0 : index
    %c20 = arith.constant 20 : index
    %60 = vector.load %arg1[%c0_63, %c0_64, %c20] : memref<1x8x228xf32, #tpu.memory_space<vmem>>, vector<1x8x204xf32>
    %61 = vector.shape_cast %60 : vector<1x8x204xf32> to vector<8x204xf32>
    %c160 = arith.constant 160 : index
    %c0_65 = arith.constant 0 : index
    %62 = vector.load %arg10[%c160, %c0_65] : memref<200x204xf32, #tpu.memory_space<vmem>>, vector<8x204xf32>
    tpu.vector_store %arg10[%c160, %c0_65], %61 {strides = array<i32>} : memref<200x204xf32, #tpu.memory_space<vmem>>, vector<8x204xf32>,
    %c0_66 = arith.constant 0 : index
    %c0_67 = arith.constant 0 : index
    %c21 = arith.constant 21 : index
    %63 = vector.load %arg1[%c0_66, %c0_67, %c21] : memref<1x8x228xf32, #tpu.memory_space<vmem>>, vector<1x8x204xf32>
    %64 = vector.shape_cast %63 : vector<1x8x204xf32> to vector<8x204xf32>
    %c168 = arith.constant 168 : index
    %c0_68 = arith.constant 0 : index
    %65 = vector.load %arg10[%c168, %c0_68] : memref<200x204xf32, #tpu.memory_space<vmem>>, vector<8x204xf32>
    tpu.vector_store %arg10[%c168, %c0_68], %64 {strides = array<i32>} : memref<200x204xf32, #tpu.memory_space<vmem>>, vector<8x204xf32>,
    %c0_69 = arith.constant 0 : index
    %c0_70 = arith.constant 0 : index
    %c22 = arith.constant 22 : index
    %66 = vector.load %arg1[%c0_69, %c0_70, %c22] : memref<1x8x228xf32, #tpu.memory_space<vmem>>, vector<1x8x204xf32>
    %67 = vector.shape_cast %66 : vector<1x8x204xf32> to vector<8x204xf32>
    %c176 = arith.constant 176 : index
    %c0_71 = arith.constant 0 : index
    %68 = vector.load %arg10[%c176, %c0_71] : memref<200x204xf32, #tpu.memory_space<vmem>>, vector<8x204xf32>
    tpu.vector_store %arg10[%c176, %c0_71], %67 {strides = array<i32>} : memref<200x204xf32, #tpu.memory_space<vmem>>, vector<8x204xf32>,
    %c0_72 = arith.constant 0 : index
    %c0_73 = arith.constant 0 : index
    %c23 = arith.constant 23 : index
    %69 = vector.load %arg1[%c0_72, %c0_73, %c23] : memref<1x8x228xf32, #tpu.memory_space<vmem>>, vector<1x8x204xf32>
    %70 = vector.shape_cast %69 : vector<1x8x204xf32> to vector<8x204xf32>
    %c184 = arith.constant 184 : index
    %c0_74 = arith.constant 0 : index
    %71 = vector.load %arg10[%c184, %c0_74] : memref<200x204xf32, #tpu.memory_space<vmem>>, vector<8x204xf32>
    tpu.vector_store %arg10[%c184, %c0_74], %70 {strides = array<i32>} : memref<200x204xf32, #tpu.memory_space<vmem>>, vector<8x204xf32>,
    %c0_75 = arith.constant 0 : index
    %c0_76 = arith.constant 0 : index
    %c24_77 = arith.constant 24 : index
    %72 = vector.load %arg1[%c0_75, %c0_76, %c24_77] : memref<1x8x228xf32, #tpu.memory_space<vmem>>, vector<1x8x204xf32>
    %73 = vector.shape_cast %72 : vector<1x8x204xf32> to vector<8x204xf32>
    %c192 = arith.constant 192 : index
    %c0_78 = arith.constant 0 : index
    %74 = vector.load %arg10[%c192, %c0_78] : memref<200x204xf32, #tpu.memory_space<vmem>>, vector<8x204xf32>
    tpu.vector_store %arg10[%c192, %c0_78], %73 {strides = array<i32>} : memref<200x204xf32, #tpu.memory_space<vmem>>, vector<8x204xf32>,
    %c0_79 = arith.constant 0 : index
    %c0_80 = arith.constant 0 : index
    %75 = vector.load %arg2[%c0_79, %c0_80] : memref<32x200xf32, #tpu.memory_space<vmem>>, vector<32x200xf32>
    %c0_81 = arith.constant 0 : index
    %c0_82 = arith.constant 0 : index
    %76 = vector.load %arg10[%c0_81, %c0_82] : memref<200x204xf32, #tpu.memory_space<vmem>>, vector<200x204xf32>
    %cst = arith.constant dense<0.000000e+00> : vector<32x204xf32>
    %77 = tpu.matmul %75, %76, %cst {dimension_numbers = #tpu.dot_dimension_numbers<[1], [0], [0], [1], [0, 0, 1, 1], [], []>} : vector<32x200xf32>, vector<200x204xf32>, vector<32x204xf32> -> vector<32x204xf32>
    %c0_83 = arith.constant 0 : index
    %c0_84 = arith.constant 0 : index
    %78 = vector.load %arg3[%c0_83, %c0_84] : memref<32x1xf32, #tpu.memory_space<vmem>>, vector<32x1xf32>
    %79 = vector.broadcast %78 : vector<32x1xf32> to vector<32x204xf32>
    %80 = arith.addf %77, %79 : vector<32x204xf32>
    %cst_85 = arith.constant 0.000000e+00 : f32
    %81 = vector.broadcast %cst_85 : f32 to vector<32x204xf32>
    %82 = arith.cmpf ogt, %80, %81 : vector<32x204xf32>
    %83 = math.exp %80 : vector<32x204xf32>
    %cst_86 = arith.constant 1.000000e+00 : f32
    %84 = vector.broadcast %cst_86 : f32 to vector<32x204xf32>
    %85 = arith.subf %83, %84 : vector<32x204xf32>
    %86 = arith.select %82, %80, %85 : vector<32x204xi1>, vector<32x204xf32>
    %c0_87 = arith.constant 0 : index
    %c0_88 = arith.constant 0 : index
    %87 = vector.load %arg4[%c0_87, %c0_88] : memref<8x32xf32, #tpu.memory_space<vmem>>, vector<8x32xf32>
    %cst_89 = arith.constant dense<0.000000e+00> : vector<8x204xf32>
    %88 = tpu.matmul %87, %86, %cst_89 {dimension_numbers = #tpu.dot_dimension_numbers<[1], [0], [0], [1], [0, 0, 1, 1], [], []>} : vector<8x32xf32>, vector<32x204xf32>, vector<8x204xf32> -> vector<8x204xf32>
    %c0_90 = arith.constant 0 : index
    %c0_91 = arith.constant 0 : index
    %89 = vector.load %arg5[%c0_90, %c0_91] : memref<8x1xf32, #tpu.memory_space<vmem>>, vector<8x1xf32>
    %90 = vector.broadcast %89 : vector<8x1xf32> to vector<8x204xf32>
    %91 = arith.addf %88, %90 : vector<8x204xf32>
    %cst_92 = arith.constant 0.000000e+00 : f32
    %92 = vector.broadcast %cst_92 : f32 to vector<8x204xf32>
    %93 = arith.cmpf ogt, %91, %92 : vector<8x204xf32>
    %94 = math.exp %91 : vector<8x204xf32>
    %cst_93 = arith.constant 1.000000e+00 : f32
    %95 = vector.broadcast %cst_93 : f32 to vector<8x204xf32>
    %96 = arith.subf %94, %95 : vector<8x204xf32>
    %97 = arith.select %93, %91, %96 : vector<8x204xi1>, vector<8x204xf32>
    %98 = arith.mulf %97, %97 : vector<8x204xf32>
    %c0_94 = arith.constant 0 : index
    %c0_95 = arith.constant 0 : index
    %99 = vector.load %arg6[%c0_94, %c0_95] : memref<204x4xf32, #tpu.memory_space<vmem>>, vector<204x4xf32>
    %cst_96 = arith.constant dense<0.000000e+00> : vector<8x4xf32>
    %100 = tpu.matmul %98, %99, %cst_96 {dimension_numbers = #tpu.dot_dimension_numbers<[1], [0], [0], [1], [0, 0, 1, 1], [], []>} : vector<8x204xf32>, vector<204x4xf32>, vector<8x4xf32> -> vector<8x4xf32>
    %101 = math.log %100 : vector<8x4xf32>
    %cst_97 = arith.constant 0.000000e+00 : f32
    %102 = vector.broadcast %cst_97 : f32 to vector<4x2xf32>
    %c0_98 = arith.constant 0 : index
    %c0_99 = arith.constant 0 : index
    %c0_100 = arith.constant 0 : index
    %103 = vector.load %arg7[%c0_98, %c0_99, %c0_100] : memref<2x4x8xf32, #tpu.memory_space<vmem>>, vector<1x4x8xf32>
    %104 = vector.shape_cast %103 : vector<1x4x8xf32> to vector<4x8xf32>
    %105 = vector.extract_strided_slice %101 {offsets = [0, 0], sizes = [8, 2], strides = [1, 1]} : vector<8x4xf32> to vector<8x2xf32>
    %cst_101 = arith.constant dense<0.000000e+00> : vector<4x2xf32>
    %106 = tpu.matmul %104, %105, %cst_101 {dimension_numbers = #tpu.dot_dimension_numbers<[1], [0], [0], [1], [0, 0, 1, 1], [], []>} : vector<4x8xf32>, vector<8x2xf32>, vector<4x2xf32> -> vector<4x2xf32>
    %107 = arith.addf %102, %106 : vector<4x2xf32>
    %c1_102 = arith.constant 1 : index
    %c0_103 = arith.constant 0 : index
    %c0_104 = arith.constant 0 : index
    %108 = vector.load %arg7[%c1_102, %c0_103, %c0_104] : memref<2x4x8xf32, #tpu.memory_space<vmem>>, vector<1x4x8xf32>
    %109 = vector.shape_cast %108 : vector<1x4x8xf32> to vector<4x8xf32>
    %110 = vector.extract_strided_slice %101 {offsets = [0, 2], sizes = [8, 2], strides = [1, 1]} : vector<8x4xf32> to vector<8x2xf32>
    %cst_105 = arith.constant dense<0.000000e+00> : vector<4x2xf32>
    %111 = tpu.matmul %109, %110, %cst_105 {dimension_numbers = #tpu.dot_dimension_numbers<[1], [0], [0], [1], [0, 0, 1, 1], [], []>} : vector<4x8xf32>, vector<8x2xf32>, vector<4x2xf32> -> vector<4x2xf32>
    %112 = arith.addf %107, %111 : vector<4x2xf32>
    %c0_106 = arith.constant 0 : index
    %c0_107 = arith.constant 0 : index
    %113 = vector.load %arg8[%c0_106, %c0_107] : memref<4x1xf32, #tpu.memory_space<vmem>>, vector<4x1xf32>
    %114 = vector.broadcast %113 : vector<4x1xf32> to vector<4x2xf32>
    %115 = arith.addf %112, %114 : vector<4x2xf32>
    %c0_108 = arith.constant 0 : index
    %c0_109 = arith.constant 0 : index
    %c0_110 = arith.constant 0 : index
    %116 = vector.load %arg9[%c0_108, %c0_109, %c0_110] : memref<1x4x2xf32, #tpu.memory_space<vmem>>, vector<1x4x2xf32>
    %117 = vector.shape_cast %116 : vector<1x4x2xf32> to vector<4x2xf32>
    %118 = vector.shape_cast %115 : vector<4x2xf32> to vector<1x4x2xf32>
    tpu.vector_store %arg9[%c0_108, %c0_109, %c0_110], %118 {strides = array<i32>} : memref<1x4x2xf32, #tpu.memory_space<vmem>>, vector<1x4x2xf32>,
    return
  }
  func.func @transform_0(%arg0: i32) -> (i32, i32, i32) {
    %c0_i32 = arith.constant 0 : i32
    %c0_i32_0 = arith.constant 0 : i32
    %c0_i32_1 = arith.constant 0 : i32
    return %arg0, %c0_i32, %c0_i32_0 : i32, i32, i32
  }
  func.func @transform_1(%arg0: i32) -> (i32, i32) {
    %c0_i32 = arith.constant 0 : i32
    %c0_i32_0 = arith.constant 0 : i32
    %c0_i32_1 = arith.constant 0 : i32
    return %c0_i32, %c0_i32_0 : i32, i32
  }
  func.func @transform_2(%arg0: i32) -> (i32, i32) {
    %c0_i32 = arith.constant 0 : i32
    %c0_i32_0 = arith.constant 0 : i32
    %c0_i32_1 = arith.constant 0 : i32
    return %c0_i32, %c0_i32_0 : i32, i32
  }
  func.func @transform_3(%arg0: i32) -> (i32, i32) {
    %c0_i32 = arith.constant 0 : i32
    %c0_i32_0 = arith.constant 0 : i32
    %c0_i32_1 = arith.constant 0 : i32
    return %c0_i32, %c0_i32_0 : i32, i32
  }
  func.func @transform_4(%arg0: i32) -> (i32, i32) {
    %c0_i32 = arith.constant 0 : i32
    %c0_i32_0 = arith.constant 0 : i32
    %c0_i32_1 = arith.constant 0 : i32
    return %c0_i32, %c0_i32_0 : i32, i32
  }
  func.func @transform_5(%arg0: i32) -> (i32, i32) {
    %c0_i32 = arith.constant 0 : i32
    %c0_i32_0 = arith.constant 0 : i32
    %c0_i32_1 = arith.constant 0 : i32
    return %c0_i32, %c0_i32_0 : i32, i32
  }
  func.func @transform_6(%arg0: i32) -> (i32, i32, i32) {
    %c0_i32 = arith.constant 0 : i32
    %c0_i32_0 = arith.constant 0 : i32
    %c0_i32_1 = arith.constant 0 : i32
    %c0_i32_2 = arith.constant 0 : i32
    return %c0_i32, %c0_i32_0, %c0_i32_1 : i32, i32, i32
  }
  func.func @transform_7(%arg0: i32) -> (i32, i32) {
    %c0_i32 = arith.constant 0 : i32
    %c0_i32_0 = arith.constant 0 : i32
    %c0_i32_1 = arith.constant 0 : i32
    return %c0_i32, %c0_i32_0 : i32, i32
  }
  func.func @transform_8(%arg0: i32) -> (i32, i32, i32) {
    %c0_i32 = arith.constant 0 : i32
    %c0_i32_0 = arith.constant 0 : i32
    %c0_i32_1 = arith.constant 0 : i32
    return %arg0, %c0_i32, %c0_i32_0 : i32, i32, i32
  }
}

</mosaic_0001>

<bundles_post_ra>
// kernel: tpu_custom_call.1
= control target key start
LH: loop header
LB: loop body
LE: loop exit
PB: predicated region body
PF: predicated region fallthrough
CT: control target
= control target key end

     0   :  { %s1468_s27 = smov 0   ;;  %s1736_s0 = inlined_call_operand.vmem [shape: f32[2,8,228], index: 0, kind: input, shape index: {}]   ;;  %s1737_s1 = inlined_call_operand.vmem [shape: f32[32,200], index: 1, kind: input, shape index: {}]   ;;  %s1738_s2 = inlined_call_operand.vmem [shape: f32[32,1], index: 2, kind: input, shape index: {}]   ;;  %s1739_s3 = inlined_call_operand.vmem [shape: f32[8,32], index: 3, kind: input, shape index: {}]   ;;  %s1740_s4 = inlined_call_operand.vmem [shape: f32[8,1], index: 4, kind: input, shape index: {}]   ;;  %s1741_s5 = inlined_call_operand.vmem [shape: f32[204,4], index: 5, kind: input, shape index: {}]   ;;  %s1742_s6 = inlined_call_operand.vmem [shape: f32[2,4,8], index: 6, kind: input, shape index: {}]   ;;  %s1743_s7 = inlined_call_operand.vmem [shape: f32[4,1], index: 7, kind: input, shape index: {}]   ;;  %s1744_s8 = inlined_call_operand.vmem [shape: f32[2,4,2], index: 8, kind: output, shape index: {}]  }
   0x1 LB: > { %s1284_s28 = sadd.s32 4294967295, %s1394_s27   ;;  %p1288_p0 = scmp.ge.s32.totalorder %s1394_s27, 1  ;;  %s1394_s27 = sphi %s1468_s27, %s18_s27  }
   0x2   : > { %p262_p1 = scmp.lt.s32.totalorder %s1394_s27, 3 }
   0x4   : > { %p263_p2 = pnand %p1288_p0, %p262_p1 }
   0x5   : > { %p295_p3 = scmp.lt.s32.totalorder (!%p263_p2), %s1284_s28, 1  ;;  %s1396_s11 = smov (!%p263_p2), 113  }
   0x6   : > { %266 = sbr.rel (%p263_p2) target bundleno = 1210 (0x4ba), region = 52  ;;  %s1397_s12 = smov (!%p263_p2), 114  }
   0x7   : > { %s1398_s13 = smov (!%p263_p2), 115   ;;  %s1399_s14 = smov (!%p263_p2), 116  }
   0x8   : > { %s1400_s15 = smov (!%p263_p2), 117   ;;  %s1401_s16 = smov (!%p263_p2), 118  }
   0x9   : > { %s1402_s17 = smov (!%p263_p2), 119   ;;  %s1403_s18 = smov (!%p263_p2), 120  }
   0xa   : > { %s1404_s19 = smov (!%p263_p2), 121   ;;  %s1405_s20 = smov (!%p263_p2), 122  }
   0xb   : > { %s1746_s28 = smov (!%p295_p3, %s1284_s28), 1  ;;  %vm307_vm0 = vcmask 621568   ;;  %s1406_s21 = smov 123   ;;  %v646_v2 = vld [vmem:[%s1737_s1 + $0x8] sm:$0xff]  ;;  %vm727_vm1 = vcmask 588800   ;;  %v706_v3 = vld [vmem:[%s1738_s2 + $0x18] sm:$0xff] }
   0xc   : > { %s1314_s29 = sshll.u32 %s1746_s28, 4  ;;  %s1407_s22 = smov 124   ;;  %1292 = vmatprep.mubr.msk.f32.mxu0 %vm727_vm1, %v646_v2  ;;  %v705_v4 = vld [vmem:[%s1738_s2 + $0x10] sm:$0xff]  ;;  %v1420_v5 = vmov 0   ;;  %v703_v6 = vld [vmem:[%s1738_s2] sm:$0xff]  ;;  %v704_v7 = vld [vmem:[%s1738_s2 + $0x8] sm:$0xff] }
   0xd   : > { %s299_s10 = scalar_lea.vmem %s1736_s0, %s1314_s29  ;;  %s1408_s23 = smov 125   ;;  %1364 = vset.pattern.permute.xlu0 %v1420_v5  ;;  %1365 = vset.pattern.permute.xlu1 %v1420_v5  ;;  %v870_v8 = vld [vmem:[%s1740_s4] sm:$0xff]  ;;  %vm513_vm2 = vcmask 924672   ;;  %vm499_vm3 = vcmask 932864   ;;  %vm485_vm4 = vcmask 941056   ;;  %vm471_vm5 = vcmask 949248  }
   0xe   : > { %v1482_v0 = vld [vmem:[%s299_s10] sm:$0xff]  ;;  %v1484_v1 = vld [vmem:[%s299_s10 + $0x8] sm:$0xff]  ;;  %s1409_s24 = smov 126   ;;  %s1410_s25 = smov 127   ;;  %vm457_vm6 = vcmask 957440   ;;  %vm443_vm7 = vcmask 965632  }
   0xf   : > { %509 = vrot.lane.b32.xlu0 %v1482_v0, %s1396_s11  ;;  %495 = vrot.lane.b32.xlu1 %v1482_v0, %s1397_s12  ;;  %308 = vst.msk [vmem:[#allocation2 + $0x8] sm:$0xff] %vm307_vm0, %v1484_v1  ;;  %s1411_s26 = smov 104   ;;  %s1412_s29 = smov 105   ;;  %v1222_v9 = vld [vmem:[%s1743_s7] sm:$0xf]  ;;  %vm429_vm8 = vcmask 973824  }
  0x10   : > { %s1413_s30 = smov 106   ;;  %s1414_s9 = smov 107   ;;  %vm415_vm9 = vcmask 982016   ;;  %vm401_vm10 = vcmask 990208   ;;  %vm387_vm11 = vcmask 998400   ;;  %vm373_vm12 = vcmask 1006592  }
  0x11   : > { %s1415_s10 = smov 108   ;;  %vm359_vm13 = vcmask 1014784   ;;  %vm345_vm14 = vcmask 1022976   ;;  %vm331_vm15 = vcmask 1031168  }
  0x13   : > { %511 = vrot.lane.b32.xlu0 %v1484_v1, %s1396_s11  ;;  %497 = vrot.lane.b32.xlu1 %v1484_v1, %s1397_s12  ;;  %s1416_s11 = smov 109   ;;  %s1417_s12 = smov 110  }
  0x17   : > { %483 = vrot.lane.b32.xlu1 %v1484_v1, %s1398_s13  ;;  %481 = vrot.lane.b32.xlu0 %v1482_v0, %s1398_s13 }
  0x1b   : > { %469 = vrot.lane.b32.xlu1 %v1484_v1, %s1399_s14  ;;  %467 = vrot.lane.b32.xlu0 %v1482_v0, %s1399_s14 }
  0x1f   : > { %455 = vrot.lane.b32.xlu1 %v1484_v1, %s1400_s15  ;;  %453 = vrot.lane.b32.xlu0 %v1482_v0, %s1400_s15  ;;  %s1418_s15 = smov 111  }
  0x23   : > { %441 = vrot.lane.b32.xlu1 %v1484_v1, %s1401_s16  ;;  %439 = vrot.lane.b32.xlu0 %v1482_v0, %s1401_s16  ;;  %s1419_s16 = smov 112  }
  0x27   : > { %427 = vrot.lane.b32.xlu1 %v1484_v1, %s1402_s17  ;;  %425 = vrot.lane.b32.xlu0 %v1482_v0, %s1402_s17 }
  0x2b   : > { %413 = vrot.lane.b32.xlu1 %v1484_v1, %s1403_s18  ;;  %411 = vrot.lane.b32.xlu0 %v1482_v0, %s1403_s18 }
  0x2f   : > { %399 = vrot.lane.b32.xlu1 %v1484_v1, %s1404_s19  ;;  %397 = vrot.lane.b32.xlu0 %v1482_v0, %s1404_s19 }
  0x33   : > { %385 = vrot.lane.b32.xlu1 %v1484_v1, %s1405_s20  ;;  %383 = vrot.lane.b32.xlu0 %v1482_v0, %s1405_s20 }
  0x37   : > { %371 = vrot.lane.b32.xlu1 %v1484_v1, %s1406_s21  ;;  %369 = vrot.lane.b32.xlu0 %v1482_v0, %s1406_s21 }
  0x3b   : > { %357 = vrot.lane.b32.xlu1 %v1484_v1, %s1407_s22  ;;  %355 = vrot.lane.b32.xlu0 %v1482_v0, %s1407_s22 }
  0x3f   : > { %343 = vrot.lane.b32.xlu1 %v1484_v1, %s1408_s23  ;;  %341 = vrot.lane.b32.xlu0 %v1482_v0, %s1408_s23 }
  0x43   : > { %329 = vrot.lane.b32.xlu1 %v1484_v1, %s1409_s24  ;;  %327 = vrot.lane.b32.xlu0 %v1482_v0, %s1409_s24 }
  0x47   : > { %315 = vrot.lane.b32.xlu1 %v1484_v1, %s1410_s25  ;;  %313 = vrot.lane.b32.xlu0 %v1482_v0, %s1410_s25 }
  0x4b   : > { %637 = vrot.lane.b32.xlu1 %v1484_v1, %s1411_s26  ;;  %635 = vrot.lane.b32.xlu0 %v1482_v0, %s1411_s26  ;;  %s1291_s26 = sshll.u32 %s1746_s28, 2 }
  0x4f   : > { %623 = vrot.lane.b32.xlu1 %v1484_v1, %s1412_s29  ;;  %621 = vrot.lane.b32.xlu0 %v1482_v0, %s1412_s29 }
  0x53   : > { %609 = vrot.lane.b32.xlu1 %v1484_v1, %s1413_s30  ;;  %607 = vrot.lane.b32.xlu0 %v1482_v0, %s1413_s30 }
  0x57   : > { %595 = vrot.lane.b32.xlu1 %v1484_v1, %s1414_s9  ;;  %593 = vrot.lane.b32.xlu0 %v1482_v0, %s1414_s9  ;;  %s303_s9 = scalar_lea.vmem %s1744_s8, %s1291_s26 }
  0x5b   : > { %581 = vrot.lane.b32.xlu1 %v1484_v1, %s1415_s10  ;;  %579 = vrot.lane.b32.xlu0 %v1482_v0, %s1415_s10 }
  0x5f   : > { %567 = vrot.lane.b32.xlu1 %v1484_v1, %s1416_s11  ;;  %565 = vrot.lane.b32.xlu0 %v1482_v0, %s1416_s11 }
  0x63   : > { %553 = vrot.lane.b32.xlu1 %v1484_v1, %s1417_s12  ;;  %551 = vrot.lane.b32.xlu0 %v1482_v0, %s1417_s12 }
  0x67   : > { %539 = vrot.lane.b32.xlu1 %v1484_v1, %s1418_s15  ;;  %537 = vrot.lane.b32.xlu0 %v1482_v0, %s1418_s15 }
  0x6b   : > { %525 = vrot.lane.b32.xlu1 %v1484_v1, %s1419_s16  ;;  %523 = vrot.lane.b32.xlu0 %v1482_v0, %s1419_s16 }
  0x6f   : > { %724 = vperm.xlu0 %1364, %v706_v3   ;;  %719 = vperm.xlu1 %1365, %v705_v4  }
  0x73   : > { %709 = vperm.xlu0 %1364, %v703_v6   ;;  %714 = vperm.xlu1 %1365, %v704_v7  }
  0x77   : > { %873 = vperm.xlu1 %1365, %v870_v8  }
  0x7b   : > { %1225 = vperm.xlu1 %1365, %v1222_v9  }
  0x81   : > { %v510_v10 = vpop.permute.xlu0 %509  ;;  %v496_v11 = vpop.permute.xlu1 %495 }
  0x85   : > { %v512_v12 = vpop.permute.xlu0 %511  ;;  %v498_v13 = vpop.permute.xlu1 %497 }
  0x86   : > { %v514_v14 = vsel %vm513_vm2, %v510_v10, %v512_v12  ;;  %518 = vst.msk [vmem:[#allocation2 + $0xf8] sm:$0xff] %vm307_vm0, %v512_v12  ;;  %v500_v15 = vsel %vm499_vm3, %v496_v11, %v498_v13  ;;  %504 = vst.msk [vmem:[#allocation2 + $0xe8] sm:$0xff] %vm307_vm0, %v498_v13  ;;  %vm317_vm2 = vcmask 1039360   ;;  %vm639_vm3 = vcmask 850944   ;;  %v654_v12 = vld [vmem:[#allocation2 + $0x8] sm:$0xff] }
  0x89   : > { %v484_v16 = vpop.permute.xlu1 %483  ;;  %v482_v17 = vpop.permute.xlu0 %481 }
  0x8a   : > { %490 = vst.msk [vmem:[#allocation2 + $0xd8] sm:$0xff] %vm307_vm0, %v484_v16  ;;  %v486_v18 = vsel %vm485_vm4, %v482_v17, %v484_v16  ;;  %vm625_vm4 = vcmask 859136  }
  0x8d   : > { %v470_v19 = vpop.permute.xlu1 %469  ;;  %v468_v20 = vpop.permute.xlu0 %467  ;;  %v684_v21 = vld [vmem:[#allocation2 + $0xf8] sm:$0xff]  ;;  %v682_v23 = vld [vmem:[#allocation2 + $0xe8] sm:$0xff] }
  0x8e   : > { %476 = vst.msk [vmem:[#allocation2 + $0xc8] sm:$0xff] %vm307_vm0, %v470_v19  ;;  %v472_v22 = vsel %vm471_vm5, %v468_v20, %v470_v19  ;;  %740 = vmatprep.subr.mxu0 %v684_v21  ;;  %vm611_vm5 = vcmask 867328  }
  0x8f   : > { %741 = vmatpush1.msra.mxu0 %v514_v14 }
  0x90   : > { %742 = vmatprep.subr.mxu0 %v682_v23 }
  0x91   : > { %743 = vmatpush1.msra.mxu0 %v500_v15  ;;  %v456_v24 = vpop.permute.xlu1 %455  ;;  %v454_v25 = vpop.permute.xlu0 %453  ;;  %v680_v26 = vld [vmem:[#allocation2 + $0xd8] sm:$0xff] }
  0x92   : > { %462 = vst.msk [vmem:[#allocation2 + $0xb8] sm:$0xff] %vm307_vm0, %v456_v24  ;;  %v458_v27 = vsel %vm457_vm6, %v454_v25, %v456_v24  ;;  %744 = vmatprep.subr.mxu0 %v680_v26  ;;  %vm597_vm6 = vcmask 875520  }
  0x93   : > { %745 = vmatpush1.msra.mxu0 %v486_v18 }
  0x95   : > { %v442_v28 = vpop.permute.xlu1 %441  ;;  %v440_v29 = vpop.permute.xlu0 %439  ;;  %v678_v30 = vld [vmem:[#allocation2 + $0xc8] sm:$0xff] }
  0x96   : > { %448 = vst.msk [vmem:[#allocation2 + $0xa8] sm:$0xff] %vm307_vm0, %v442_v28  ;;  %v444_v31 = vsel %vm443_vm7, %v440_v29, %v442_v28  ;;  %746 = vmatprep.subr.mxu0 %v678_v30  ;;  %vm583_vm7 = vcmask 883712  }
  0x97   : > { %747 = vmatpush1.msra.mxu0 %v472_v22 }
  0x99   : > { %v428_v32 = vpop.permute.xlu1 %427  ;;  %v426_v33 = vpop.permute.xlu0 %425  ;;  %v676_v34 = vld [vmem:[#allocation2 + $0xb8] sm:$0xff] }
  0x9a   : > { %434 = vst.msk [vmem:[#allocation2 + $0x98] sm:$0xff] %vm307_vm0, %v428_v32  ;;  %v430_v35 = vsel %vm429_vm8, %v426_v33, %v428_v32  ;;  %748 = vmatprep.subr.mxu0 %v676_v34  ;;  %vm569_vm8 = vcmask 891904  }
  0x9b   : > { %749 = vmatpush1.msra.mxu0 %v458_v27 }
  0x9d   : > { %v414_v36 = vpop.permute.xlu1 %413  ;;  %v412_v37 = vpop.permute.xlu0 %411  ;;  %v674_v38 = vld [vmem:[#allocation2 + $0xa8] sm:$0xff] }
  0x9e   : > { %420 = vst.msk [vmem:[#allocation2 + $0x88] sm:$0xff] %vm307_vm0, %v414_v36  ;;  %v416_v39 = vsel %vm415_vm9, %v412_v37, %v414_v36  ;;  %750 = vmatprep.subr.mxu0 %v674_v38  ;;  %vm555_vm9 = vcmask 900096  }
  0x9f   : > { %751 = vmatpush1.msra.mxu0 %v444_v31 }
  0xa1   : > { %v400_v40 = vpop.permute.xlu1 %399  ;;  %v398_v41 = vpop.permute.xlu0 %397  ;;  %v672_v42 = vld [vmem:[#allocation2 + $0x98] sm:$0xff] }
  0xa2   : > { %406 = vst.msk [vmem:[#allocation2 + $0x78] sm:$0xff] %vm307_vm0, %v400_v40  ;;  %v402_v43 = vsel %vm401_vm10, %v398_v41, %v400_v40  ;;  %752 = vmatprep.subr.mxu0 %v672_v42  ;;  %vm541_vm10 = vcmask 908288  }
  0xa3   : > { %753 = vmatpush1.msra.mxu0 %v430_v35 }
  0xa5   : > { %v386_v44 = vpop.permute.xlu1 %385  ;;  %v384_v45 = vpop.permute.xlu0 %383  ;;  %v670_v46 = vld [vmem:[#allocation2 + $0x88] sm:$0xff] }
  0xa6   : > { %392 = vst.msk [vmem:[#allocation2 + $0x68] sm:$0xff] %vm307_vm0, %v386_v44  ;;  %v388_v47 = vsel %vm387_vm11, %v384_v45, %v386_v44  ;;  %754 = vmatprep.subr.mxu0 %v670_v46  ;;  %vm527_vm11 = vcmask 916480   ;;  %v648_v44 = vld [vmem:[%s1737_s1 + $0x18] sm:$0xff]  ;;  %v647_v45 = vld [vmem:[%s1737_s1 + $0x10] sm:$0xff]  ;;  %v650_v46 = vld [vmem:[%s1737_s1 + $0x28] sm:$0xff] }
  0xa7   : > { %755 = vmatpush1.msra.mxu0 %v416_v39 }
  0xa9   : > { %v372_v48 = vpop.permute.xlu1 %371  ;;  %v370_v49 = vpop.permute.xlu0 %369  ;;  %v668_v50 = vld [vmem:[#allocation2 + $0x78] sm:$0xff] }
  0xaa   : > { %378 = vst.msk [vmem:[#allocation2 + $0x58] sm:$0xff] %vm307_vm0, %v372_v48  ;;  %v374_v51 = vsel %vm373_vm12, %v370_v49, %v372_v48  ;;  %756 = vmatprep.subr.mxu0 %v668_v50  ;;  %v652_v48 = vld [vmem:[%s1737_s1 + $0x38] sm:$0xff]  ;;  %v651_v49 = vld [vmem:[%s1737_s1 + $0x30] sm:$0xff]  ;;  %v1421_v50 = vmov 0.0  }
  0xab   : > { %757 = vmatpush1.msra.mxu0 %v402_v43  ;;  %v645_v43 = vld [vmem:[%s1737_s1] sm:$0xff]  ;;  %944 = vmatprep.mubr.f32.mxu1 %v1421_v50 }
  0xad   : > { %v358_v52 = vpop.permute.xlu1 %357  ;;  %v356_v53 = vpop.permute.xlu0 %355  ;;  %v666_v54 = vld [vmem:[#allocation2 + $0x68] sm:$0xff] }
  0xae   : > { %364 = vst.msk [vmem:[#allocation2 + $0x48] sm:$0xff] %vm307_vm0, %v358_v52  ;;  %v360_v55 = vsel %vm359_vm13, %v356_v53, %v358_v52  ;;  %758 = vmatprep.subr.mxu0 %v666_v54 }
  0xaf   : > { %759 = vmatpush1.msra.mxu0 %v388_v47  ;;  %v649_v47 = vld [vmem:[%s1737_s1 + $0x20] sm:$0xff] }
  0xb1   : > { %v344_v56 = vpop.permute.xlu1 %343  ;;  %v342_v57 = vpop.permute.xlu0 %341  ;;  %v664_v58 = vld [vmem:[#allocation2 + $0x58] sm:$0xff] }
  0xb2   : > { %350 = vst.msk [vmem:[#allocation2 + $0x38] sm:$0xff] %vm307_vm0, %v344_v56  ;;  %v346_v59 = vsel %vm345_vm14, %v342_v57, %v344_v56  ;;  %760 = vmatprep.subr.mxu0 %v664_v58 }
  0xb3   : > { %761 = vmatpush1.msra.mxu0 %v374_v51 }
  0xb5   : > { %v330_v60 = vpop.permute.xlu1 %329  ;;  %v328_v61 = vpop.permute.xlu0 %327  ;;  %v662_v62 = vld [vmem:[#allocation2 + $0x48] sm:$0xff] }
  0xb6   : > { %336 = vst.msk [vmem:[#allocation2 + $0x28] sm:$0xff] %vm307_vm0, %v330_v60  ;;  %v332_v63 = vsel %vm331_vm15, %v328_v61, %v330_v60  ;;  %762 = vmatprep.subr.mxu0 %v662_v62 }
  0xb7   : > { %763 = vmatpush1.msra.mxu0 %v360_v55 }
  0xb9   : > { %v316_v1 = vpop.permute.xlu1 %315  ;;  %v314_v2 = vpop.permute.xlu0 %313  ;;  %v660_v3 = vld [vmem:[#allocation2 + $0x38] sm:$0xff] }
  0xba   : > { %322 = vst.msk [vmem:[#allocation2 + $0x18] sm:$0xff] %vm307_vm0, %v316_v1  ;;  %v318_v4 = vsel %vm317_vm2, %v314_v2, %v316_v1  ;;  %764 = vmatprep.subr.mxu0 %v660_v3 }
  0xbb   : > { %765 = vmatpush1.msra.mxu0 %v346_v59 }
  0xbd   : > { %v638_v5 = vpop.permute.xlu1 %637  ;;  %v636_v6 = vpop.permute.xlu0 %635  ;;  %v658_v7 = vld [vmem:[#allocation2 + $0x28] sm:$0xff] }
  0xbe   : > { %644 = vst.msk [vmem:[#allocation2 + $0x188] sm:$0xff] %vm307_vm0, %v638_v5  ;;  %v640_v8 = vsel %vm639_vm3, %v636_v6, %v638_v5  ;;  %766 = vmatprep.subr.mxu0 %v658_v7 }
  0xbf   : > { %767 = vmatpush1.msra.mxu0 %v332_v63 }
  0xc1   : > { %v624_v9 = vpop.permute.xlu1 %623  ;;  %v622_v10 = vpop.permute.xlu0 %621  ;;  %v656_v11 = vld [vmem:[#allocation2 + $0x18] sm:$0xff] }
  0xc2   : > { %630 = vst.msk [vmem:[#allocation2 + $0x178] sm:$0xff] %vm307_vm0, %v624_v9  ;;  %v626_v13 = vsel %vm625_vm4, %v622_v10, %v624_v9  ;;  %768 = vmatprep.subr.mxu0 %v656_v11 }
  0xc3   : > { %769 = vmatpush1.msra.mxu0 %v318_v4 }
  0xc4   : > { %770 = vmatprep.subr.mxu0 %v654_v12 }
  0xc5   : > { %v610_v14 = vpop.permute.xlu1 %609  ;;  %v608_v15 = vpop.permute.xlu0 %607  ;;  %771 = vmatpush1.msra.mxu0 %v1482_v0  ;;  %v702_v16 = vld [vmem:[#allocation2 + $0x188] sm:$0xff] }
  0xc6   : > { %616 = vst.msk [vmem:[#allocation2 + $0x168] sm:$0xff] %vm307_vm0, %v610_v14  ;;  %v612_v17 = vsel %vm611_vm5, %v608_v15, %v610_v14  ;;  %786 = vmatprep.subr.mxu0 %v702_v16  ;;  %vm876_vm5 = vcmask 261120  }
  0xc7   : > { %787 = vmatpush2.msra.mxu0 %v640_v8 }
  0xc9   : > { %v596_v18 = vpop.permute.xlu1 %595  ;;  %v594_v19 = vpop.permute.xlu0 %593  ;;  %v700_v20 = vld [vmem:[#allocation2 + $0x178] sm:$0xff] }
  0xca   : > { %602 = vst.msk [vmem:[#allocation2 + $0x158] sm:$0xff] %vm307_vm0, %v596_v18  ;;  %v598_v21 = vsel %vm597_vm6, %v594_v19, %v596_v18  ;;  %788 = vmatprep.subr.mxu0 %v700_v20  ;;  %vm992_vm6 = vcmask 1043456  }
  0xcb   : > { %789 = vmatpush2.msra.mxu0 %v626_v13 }
  0xcd   : > { %v582_v22 = vpop.permute.xlu1 %581  ;;  %v580_v23 = vpop.permute.xlu0 %579  ;;  %v698_v24 = vld [vmem:[#allocation2 + $0x168] sm:$0xff] }
  0xce   : > { %588 = vst.msk [vmem:[#allocation2 + $0x148] sm:$0xff] %vm307_vm0, %v582_v22  ;;  %v584_v0 = vsel %vm583_vm7, %v580_v23, %v582_v22  ;;  %790 = vmatprep.subr.mxu0 %v698_v24 }
  0xcf   : > { %791 = vmatpush2.msra.mxu0 %v612_v17 }
  0xd1   : > { %v568_v25 = vpop.permute.xlu1 %567  ;;  %v566_v26 = vpop.permute.xlu0 %565  ;;  %v696_v27 = vld [vmem:[#allocation2 + $0x158] sm:$0xff] }
  0xd2   : > { %574 = vst.msk [vmem:[#allocation2 + $0x138] sm:$0xff] %vm307_vm0, %v568_v25  ;;  %v570_v28 = vsel %vm569_vm8, %v566_v26, %v568_v25  ;;  %792 = vmatprep.subr.mxu0 %v696_v27 }
  0xd3   : > { %793 = vmatpush2.msra.mxu0 %v598_v21 }
  0xd5   : > { %v554_v29 = vpop.permute.xlu1 %553  ;;  %v552_v30 = vpop.permute.xlu0 %551  ;;  %v694_v31 = vld [vmem:[#allocation2 + $0x148] sm:$0xff] }
  0xd6   : > { %560 = vst.msk [vmem:[#allocation2 + $0x128] sm:$0xff] %vm307_vm0, %v554_v29  ;;  %v556_v32 = vsel %vm555_vm9, %v552_v30, %v554_v29  ;;  %794 = vmatprep.subr.mxu0 %v694_v31  ;;  %vm1422_vm9 = vmmov 0  }
  0xd7   : > { %795 = vmatpush2.msra.mxu0 %v584_v0 }
  0xd9   : > { %v540_v33 = vpop.permute.xlu1 %539  ;;  %v538_v34 = vpop.permute.xlu0 %537  ;;  %v692_v35 = vld [vmem:[#allocation2 + $0x138] sm:$0xff] }
  0xda   : > { %546 = vst.msk [vmem:[#allocation2 + $0x118] sm:$0xff] %vm307_vm0, %v540_v33  ;;  %v542_v36 = vsel %vm541_vm10, %v538_v34, %v540_v33  ;;  %796 = vmatprep.subr.mxu0 %v692_v35  ;;  %vm1075_vm10 = vcmask 64512  }
  0xdb   : > { %797 = vmatpush2.msra.mxu0 %v570_v28 }
  0xdd   : > { %v526_v37 = vpop.permute.xlu1 %525  ;;  %v524_v38 = vpop.permute.xlu0 %523  ;;  %v690_v39 = vld [vmem:[#allocation2 + $0x128] sm:$0xff] }
  0xde   : > { %532 = vst.msk [vmem:[#allocation2 + $0x108] sm:$0xff] %vm307_vm0, %v526_v37  ;;  %v528_v40 = vsel %vm527_vm11, %v524_v38, %v526_v37  ;;  %798 = vmatprep.subr.mxu0 %v690_v39  ;;  %v869_v38 = vld [vmem:[%s1739_s3] sm:$0xff] }
  0xdf   : > { %799 = vmatpush2.msra.mxu0 %v556_v32 }
  0xe1   : > { %v688_v41 = vld [vmem:[#allocation2 + $0x118] sm:$0xff] }
  0xe2   : > { %800 = vmatprep.subr.mxu0 %v688_v41  ;;  %v977_v41 = vld [vmem:[%s1741_s5 + $0x70] sm:$0xff] }
  0xe3   : > { %801 = vmatpush2.msra.mxu0 %v542_v36 }
  0xe5   : > { %v686_v42 = vld [vmem:[#allocation2 + $0x108] sm:$0xff] }
  0xe6   : > { %802 = vmatprep.subr.mxu0 %v686_v42  ;;  %v976_v42 = vld [vmem:[%s1741_s5 + $0x68] sm:$0xff] }
  0xe7   : > { %803 = vmatpush2.msra.mxu0 %v528_v40  ;;  %v978_v40 = vld [vmem:[%s1741_s5 + $0x78] sm:$0xff] }
  0xe8   : > { %805 = vmatmul.mubr.f32.vlgmr.msra.gmra.mxu0 %v645_v43  ;;  %1324 = vmatprep.subr.mxu0 %v1421_v50  ;;  %v975_v43 = vld [vmem:[%s1741_s5 + $0x60] sm:$0xff] }
  0xe9   : > { %1293 = vmatprep.mubr.msk.f32.mxu0 %vm727_vm1, %v648_v44  ;;  %v974_v44 = vld [vmem:[%s1741_s5 + $0x58] sm:$0xff] }
  0xea   : > { %v720_v51 = vpop.permute.xlu1 %719  ;;  %v725_v55 = vpop.permute.xlu0 %724 }
  0xec   : > { %811 = vmatmul.mubr.f32.gmra.mxu0 %v647_v45  ;;  %v973_v45 = vld [vmem:[%s1741_s5 + $0x50] sm:$0xff] }
  0xed   : > { %1294 = vmatprep.mubr.msk.f32.mxu0 %vm727_vm1, %v650_v46  ;;  %v972_v46 = vld [vmem:[%s1741_s5 + $0x48] sm:$0xff] }
  0xee   : > { %v715_v56 = vpop.permute.xlu1 %714  ;;  %v710_v62 = vpop.permute.xlu0 %709 }
  0xf0   : > { %817 = vmatmul.mubr.f32.gmra.mxu0 %v649_v47  ;;  %v971_v47 = vld [vmem:[%s1741_s5 + $0x40] sm:$0xff] }
  0xf1   : > { %1295 = vmatprep.mubr.msk.f32.mxu0 %vm727_vm1, %v652_v48  ;;  %v970_v48 = vld [vmem:[%s1741_s5 + $0x38] sm:$0xff] }
  0xf4   : > { %823 = vmatmul.mubr.f32.gmra.mxu0 %v651_v49  ;;  %v969_v49 = vld [vmem:[%s1741_s5 + $0x30] sm:$0xff] }
  0xf5   : > { %1326 = vmatprep.mubr.msk.f32.mxu0 %vm1422_vm9, %v1421_v50 }
 0x1a8   : > { %v806_v52 = vpop.f32.mrf.mxu0 }
 0x1a9   : > { %v807_v7 = vadd.f32 %v806_v52, %v710_v62  ;;  %v967_v52 = vld [vmem:[%s1741_s5 + $0x20] sm:$0xff] }
 0x1aa   : > { %v808_v53 = vpop.f32.mrf.mxu0 }
 0x1ab   : > { %v809_v4 = vadd.f32 %v808_v53, %v710_v62  ;;  %v837_v15 = vmul.f32 1.442695, %v807_v7  ;;  %vm829_vm4 = vcmp.gt.f32.partialorder %v807_v7, 0.0  ;;  %v966_v53 = vld [vmem:[%s1741_s5 + $0x18] sm:$0xff]  ;;  %v983_v62 = vld [vmem:[%s1741_s5 + $0xa0] sm:$0xff] }
 0x1ac   : > { %v812_v54 = vpop.f32.mrf.mxu0 }
 0x1ad   : > { %v813_v2 = vadd.f32 %v812_v54, %v715_v56  ;;  %v839_v13 = vmul.f32 1.442695, %v809_v4  ;;  %vm830_vm3 = vcmp.gt.f32.partialorder %v809_v4, 0.0  ;;  %v965_v54 = vld [vmem:[%s1741_s5 + $0x10] sm:$0xff] }
 0x1ae   : > { %v814_v57 = vpop.f32.mrf.mxu0 }
 0x1af   : > { %v815_v58 = vadd.f32 %v814_v57, %v715_v56  ;;  %v841_v12 = vmul.f32 1.442695, %v813_v2  ;;  %vm831_vm2 = vcmp.gt.f32.partialorder %v813_v2, 0.0  ;;  %v963_v56 = vld [vmem:[%s1741_s5] sm:$0xff]  ;;  %v988_v57 = vld [vmem:[%s1741_s5 + $0xc8] sm:$0xf] }
 0x1b0   : > { %v818_v59 = vpop.f32.mrf.mxu0 }
 0x1b1   : > { %v819_v60 = vadd.f32 %v818_v59, %v720_v51  ;;  %v843_v63 = vmul.f32 1.442695, %v815_v58  ;;  %vm832_vm15 = vcmp.gt.f32.partialorder %v815_v58, 0.0  ;;  %v986_v59 = vld [vmem:[%s1741_s5 + $0xb8] sm:$0xff] }
 0x1b2   : > { %v820_v61 = vpop.f32.mrf.mxu0 }
 0x1b3   : > { %v821_v1 = vadd.f32 %v820_v61, %v720_v51  ;;  %v845_v8 = vmul.f32 1.442695, %v819_v60  ;;  %1366 = vpow2.f32 %v843_v63  ;;  %vm833_vm14 = vcmp.gt.f32.partialorder %v819_v60, 0.0  ;;  %v968_v51 = vld [vmem:[%s1741_s5 + $0x28] sm:$0xff]  ;;  %v982_v63 = vld [vmem:[%s1741_s5 + $0x98] sm:$0xff] }
 0x1b4   : > { %v824_v3 = vpop.f32.mrf.mxu0  ;;  %v984_v61 = vld [vmem:[%s1741_s5 + $0xa8] sm:$0xff] }
 0x1b5   : > { %v847_v5 = vmul.f32 1.442695, %v821_v1  ;;  %v825_v6 = vadd.f32 %v824_v3, %v725_v55  ;;  %vm834_vm13 = vcmp.gt.f32.partialorder %v821_v1, 0.0  ;;  %v979_v3 = vld [vmem:[%s1741_s5 + $0x80] sm:$0xff] }
 0x1b6   : > { %v826_v9 = vpop.f32.mrf.mxu0 }
 0x1b7   : > { %v849_v10 = vmul.f32 1.442695, %v825_v6  ;;  %v827_v11 = vadd.f32 %v826_v9, %v725_v55  ;;  %1368 = vpow2.f32 %v847_v5  ;;  %vm835_vm12 = vcmp.gt.f32.partialorder %v825_v6, 0.0  ;;  %v964_v55 = vld [vmem:[%s1741_s5 + $0x8] sm:$0xff] }
 0x1b9   : > { %1370 = vpow2.f32 %v849_v10  ;;  %v851_v14 = vmul.f32 1.442695, %v827_v11  ;;  %vm836_vm1 = vcmp.gt.f32.partialorder %v827_v11, 0.0 }
 0x1ba   : > { %1372 = vpow2.f32 %v845_v8 }
 0x1bb   : > { %1374 = vpow2.f32 %v851_v14 }
 0x1bc   : > { %1376 = vpow2.f32 %v841_v12 }
 0x1bd   : > { %1378 = vpow2.f32 %v839_v13 }
 0x1be   : > { %1380 = vpow2.f32 %v837_v15 }
 0x1c0   : > { %v1367_v16 = vpop.eup %1366 }
 0x1c1   : > { %v1299_v28 = vadd.f32 -1.0, %v1367_v16 }
 0x1c3   : > { %v864_v35 = vsel %vm832_vm15, %v815_v58, %v1299_v28  ;;  %v987_v58 = vld [vmem:[%s1741_s5 + $0xc0] sm:$0xff] }
 0x1c4   : > { %v1369_v17 = vpop.eup %1368 }
 0x1c5   : > { %v1301_v24 = vadd.f32 -1.0, %v1369_v17 }
 0x1c6   : > { %v1371_v18 = vpop.eup %1370 }
 0x1c7   : > { %v1373_v19 = vpop.eup %1372  ;;  %v1302_v21 = vadd.f32 -1.0, %v1371_v18  ;;  %v866_v31 = vsel %vm834_vm13, %v821_v1, %v1301_v24  ;;  %v981_v1 = vld [vmem:[%s1741_s5 + $0x90] sm:$0xff]  ;;  %v1309_v24 = vld [vmem:[%s1742_s6 + $0x4] sm:$0xf] }
 0x1c8   : > { %v1375_v20 = vpop.eup %1374  ;;  %v1300_v25 = vadd.f32 -1.0, %v1373_v19 }
 0x1c9   : > { %v1377_v22 = vpop.eup %1376  ;;  %v1303_v23 = vadd.f32 -1.0, %v1375_v20  ;;  %v867_v29 = vsel %vm835_vm12, %v825_v6, %v1302_v21 }
 0x1ca   : > { %v1379_v0 = vpop.eup %1378  ;;  %v1298_v30 = vadd.f32 -1.0, %v1377_v22  ;;  %v865_v33 = vsel %vm833_vm14, %v819_v60, %v1300_v25  ;;  %v985_v60 = vld [vmem:[%s1741_s5 + $0xb0] sm:$0xff] }
 0x1cb   : > { %v1381_v26 = vpop.eup %1380  ;;  %v868_v27 = vsel %vm836_vm1, %v827_v11, %v1303_v23  ;;  %v1297_v32 = vadd.f32 -1.0, %v1379_v0  ;;  %v1068_v23 = vld [vmem:[%s1742_s6] sm:$0xf] }
 0x1cc   : > { %904 = vmatprep.subr.mxu1 %v868_v27  ;;  %v1296_v34 = vadd.f32 -1.0, %v1381_v26  ;;  %v863_v36 = vsel %vm831_vm2, %v813_v2, %v1298_v30  ;;  %v980_v2 = vld [vmem:[%s1741_s5 + $0x88] sm:$0xff] }
 0x1cd   : > { %905 = vmatpush1.msra.mxu1 %v867_v29  ;;  %v862_v37 = vsel %vm830_vm3, %v809_v4, %v1297_v32  ;;  %v874_v4 = vpop.permute.xlu1 %873 }
 0x1ce   : > { %906 = vmatprep.subr.mxu1 %v866_v31  ;;  %v861_v39 = vsel %vm829_vm4, %v807_v7, %v1296_v34 }
 0x1cf   : > { %907 = vmatpush1.msra.mxu1 %v865_v33 }
 0x1d0   : > { %908 = vmatprep.subr.mxu1 %v864_v35 }
 0x1d1   : > { %909 = vmatpush1.msra.mxu1 %v863_v36  ;;  %v1226_v28 = vpop.permute.xlu1 %1225 }
 0x1d2   : > { %910 = vmatprep.subr.mxu1 %v862_v37 }
 0x1d3   : > { %911 = vmatpush1.msra.mxu1 %v861_v39 }
 0x1d4   : > { %1304 = vmatmul.mubr.msk.f32.vlgmr.msra.gmra.mxu1 %vm876_vm5, %v869_v38  ;;  %996 = vmatprep.subr.mxu1 %v1421_v50 }
 0x1d5   : > { %997 = vmatpush1.msra.mxu1 %v978_v40 }
 0x1d6   : > { %998 = vmatprep.subr.mxu1 %v1421_v50 }
 0x1d7   : > { %999 = vmatpush1.msra.mxu1 %v977_v41 }
 0x1d8   : > { %1000 = vmatprep.subr.mxu1 %v1421_v50 }
 0x1d9   : > { %1001 = vmatpush1.msra.mxu1 %v976_v42 }
 0x1da   : > { %1002 = vmatprep.subr.mxu1 %v1421_v50 }
 0x1db   : > { %1003 = vmatpush1.msra.mxu1 %v975_v43 }
 0x1dc   : > { %1004 = vmatprep.subr.mxu1 %v1421_v50 }
 0x1dd   : > { %1005 = vmatpush1.msra.mxu1 %v974_v44 }
 0x1de   : > { %1006 = vmatprep.subr.mxu1 %v1421_v50 }
 0x1df   : > { %1007 = vmatpush1.msra.mxu1 %v973_v45 }
 0x1e0   : > { %1008 = vmatprep.subr.mxu1 %v1421_v50 }
 0x1e1   : > { %1009 = vmatpush1.msra.mxu1 %v972_v46 }
 0x1e2   : > { %1010 = vmatprep.subr.mxu1 %v1421_v50 }
 0x1e3   : > { %1011 = vmatpush1.msra.mxu1 %v971_v47 }
 0x1e4   : > { %1012 = vmatprep.subr.mxu1 %v1421_v50 }
 0x1e5   : > { %1013 = vmatpush1.msra.mxu1 %v970_v48 }
 0x1e6   : > { %1014 = vmatprep.subr.mxu1 %v1421_v50 }
 0x1e7   : > { %1015 = vmatpush1.msra.mxu1 %v969_v49 }
 0x1e8   : > { %1016 = vmatprep.subr.mxu1 %v1421_v50 }
 0x1e9   : > { %1017 = vmatpush1.msra.mxu1 %v968_v51 }
 0x1ea   : > { %1018 = vmatprep.subr.mxu1 %v1421_v50 }
 0x1eb   : > { %1019 = vmatpush1.msra.mxu1 %v967_v52 }
 0x1ec   : > { %1020 = vmatprep.subr.mxu1 %v1421_v50 }
 0x1ed   : > { %1021 = vmatpush1.msra.mxu1 %v966_v53 }
 0x1ee   : > { %1022 = vmatprep.subr.mxu1 %v1421_v50 }
 0x1ef   : > { %1023 = vmatpush1.msra.mxu1 %v965_v54 }
 0x1f0   : > { %1024 = vmatprep.subr.mxu1 %v1421_v50 }
 0x1f1   : > { %1025 = vmatpush1.msra.mxu1 %v964_v55 }
 0x1f2   : > { %1026 = vmatprep.subr.mxu1 %v1421_v50 }
 0x1f3   : > { %1027 = vmatpush1.msra.mxu1 %v963_v56 }
 0x1f4   : > { %1040 = vmatprep.subr.mxu1 %v1421_v50 }
 0x1f5   : > { %1307 = vmatpush2.msk.msra.mxu1 %vm992_vm6, %v988_v57 }
 0x1f6   : > { %1042 = vmatprep.subr.mxu1 %v1421_v50 }
 0x1f7   : > { %1043 = vmatpush2.msra.mxu1 %v987_v58 }
 0x1f8   : > { %1044 = vmatprep.subr.mxu1 %v1421_v50 }
 0x1f9   : > { %1045 = vmatpush2.msra.mxu1 %v986_v59 }
 0x1fa   : > { %1046 = vmatprep.subr.mxu1 %v1421_v50 }
 0x1fb   : > { %1047 = vmatpush2.msra.mxu1 %v985_v60 }
 0x1fc   : > { %1048 = vmatprep.subr.mxu1 %v1421_v50 }
 0x1fd   : > { %1049 = vmatpush2.msra.mxu1 %v984_v61 }
 0x1fe   : > { %1050 = vmatprep.subr.mxu1 %v1421_v50 }
 0x1ff   : > { %1051 = vmatpush2.msra.mxu1 %v983_v62 }
 0x200   : > { %1052 = vmatprep.subr.mxu1 %v1421_v50 }
 0x201   : > { %1053 = vmatpush2.msra.mxu1 %v982_v63 }
 0x202   : > { %1054 = vmatprep.subr.mxu1 %v1421_v50 }
 0x203   : > { %1055 = vmatpush2.msra.mxu1 %v981_v1 }
 0x204   : > { %1056 = vmatprep.subr.mxu1 %v1421_v50 }
 0x205   : > { %1057 = vmatpush2.msra.mxu1 %v980_v2 }
 0x206   : > { %1058 = vmatprep.subr.mxu1 %v1421_v50 }
 0x207   : > { %1059 = vmatpush2.msra.mxu1 %v979_v3 }
 0x208   : > { %1319 = vmatprep.subr.mxu1 %v1421_v50 }
 0x294   : > { %v946_v5 = vpop.f32.mrf.mxu1 }
 0x295   : > { %v947_v6 = vadd.f32 %v946_v5, %v874_v4 }
 0x296   : > { %v948_v7 = vpop.f32.mrf.mxu1 }
 0x297   : > { %v953_v8 = vmul.f32 1.442695, %v947_v6  ;;  %v949_v9 = vadd.f32 %v948_v7, %v874_v4  ;;  %vm951_vm7 = vcmp.gt.f32.partialorder %v947_v6, 0.0 }
 0x299   : > { %1382 = vpow2.f32 %v953_v8  ;;  %v955_v10 = vmul.f32 1.442695, %v949_v9  ;;  %vm952_vm8 = vcmp.gt.f32.partialorder %v949_v9, 0.0 }
 0x29b   : > { %1384 = vpow2.f32 %v955_v10 }
 0x2a6   : > { %v1383_v11 = vpop.eup %1382 }
 0x2a7   : > { %v1305_v12 = vadd.f32 -1.0, %v1383_v11 }
 0x2a8   : > { %v1385_v13 = vpop.eup %1384 }
 0x2a9   : > { %v1306_v14 = vadd.f32 -1.0, %v1385_v13  ;;  %v959_v15 = vsel %vm951_vm7, %v947_v6, %v1305_v12 }
 0x2aa   : > { %v961_v18 = vmul.f32 %v959_v15, %v959_v15 }
 0x2ab   : > { %v960_v16 = vsel %vm952_vm8, %v949_v9, %v1306_v14 }
 0x2ac   : > { %v962_v17 = vmul.f32 %v960_v16, %v960_v16 }
 0x2ae   : > { %1308 = vmatprep.mubr.msk.f32.mxu1 %vm307_vm0, %v962_v17  ;;  %vm1229_vm0 = vcmask 11264  }
 0x2af   : > { %1061 = vmatmul.mubr.f32.vlgmr.msra.gmra.mxu1 %v961_v18 }
 0x2b0   : > { %1321 = vmatprep.mubr.msk.f32.mxu1 %vm1422_vm9, %v1421_v50 }
 0x36f   : > { %v1062_v19 = vpop.f32.mrf.mxu1 }
 0x370   : > { %1386 = vlog2.f32 %v1062_v19 }
 0x371   : > { %v1064_v20 = vpop.f32.mrf.mxu1 }
 0x37d   : > { %v1387_v21 = vpop.eup %1386 }
 0x37e   : > { %v1067_v22 = vmul.f32 0.6931472, %v1387_v21 }
 0x380   : > { %1072 = vrot.lane.b32.xlu0 %v1067_v22, %s1409_s24  ;;  %1325 = vmatpush3.msra.mxu0 %v1067_v22 }
 0x381   : > { %1327 = vmatmul.mubr.msk.f32.vlgmr.msra.gmra.mxu0 %vm1075_vm10, %v1068_v23 }
 0x3f2   : > { %v1073_v0 = vpop.permute.xlu0 %1072 }
 0x3f3   : > { %1320 = vmatpush3.msra.mxu1 %v1073_v0 }
 0x3f4   : > { %1322 = vmatmul.mubr.msk.f32.vlgmr.msra.gmra.mxu1 %vm1075_vm10, %v1309_v24 }
 0x441   : > { %v1218_v25 = vpop.f32.mrf.mxu0 }
 0x443   : > { %v1328_v50 = vpop.f32.mrf.mxu0 }
 0x4b4   : > { %v1145_v26 = vpop.f32.mrf.mxu1 }
 0x4b5   : > { %v1219_v27 = vadd.f32 %v1218_v25, %v1145_v26 }
 0x4b6   : > { %v1323_v29 = vpop.f32.mrf.mxu1 }
 0x4b7   : > { %v1228_v30 = vadd.f32 %v1226_v28, %v1219_v27 }
 0x4b9   : > { %1230 = vst.msk [vmem:[%s303_s9] sm:$0xf] %vm1229_vm0, %v1228_v30 }
 0x4ba PF: > { %s18_s27 = sadd.s32 1, %s1394_s27  }
 0x4bb   : > { %p15_p4 = scmp.ge.s32.totalorder %s18_s27, 4  }
 0x4bd   :  { %17 = sbr.rel (!%p15_p4) target bundleno = 1 (0x1), region = 83 }

</bundles_post_ra>
